<compile_context>
chip_gen: v7x
topology: tpu7x:2x2x1
jax: 0.10.0
libtpu: 0.0.40
codegen_flags: <defaults>
</compile_context>

<pallas_src>
import jax
import jax.numpy as jnp
from jax.experimental import pallas as pl
from jax.experimental.pallas import tpu as pltpu

NUM_EMBED = 50  # table size from nn.Embedding(50, num_pos_feats)


def _pos_embed_kernel(colt_ref, rowt_ref, o_ref):
    # colt_ref: (F, W)   col_embed[:W].T  (feature on sublanes, width on lanes)
    # rowt_ref: (F, H)   row_embed[:H].T
    # o_ref:    (2F, H*W) flattened NCHW slab: o[c, i*W + j]
    F, W = colt_ref.shape
    H = rowt_ref.shape[1]

    col_t = colt_ref[...]  # (F, W)
    row_t = rowt_ref[...]  # (F, H)

    # Top half: o[c, i*W + j] = col_t[c, j]  -> tile col_t H times along lanes.
    top = jnp.concatenate([col_t] * H, axis=-1)  # (F, H*W)

    # Bottom half: o[F + c, i*W + j] = row_t[c, i]
    #   -> broadcast lane-column i of row_t across W lanes, concat along lanes.
    bot = jnp.concatenate(
        [jnp.broadcast_to(row_t[:, i:i + 1], (F, W)) for i in range(H)],
        axis=-1)  # (F, H*W)

    # Two full-width, sublane-aligned stores (no (H, W, 2F) intermediates).
    o_ref[0:F, :] = top
    o_ref[F:2 * F, :] = bot


@jax.jit
def position_embedding_learned(x, mask, row_weight, col_weight):
    """Pallas equivalent of PositionEmbeddingLearned.forward.

    x: (B, C, H, W) -- only its shape is used (as in the PyTorch module).
    mask: unused (kept for signature parity with the PyTorch forward).
    row_weight, col_weight: (50, F) float32 embedding tables.
    Returns pos: (B, 2F, H, W) float32.
    """
    del mask  # unused by the reference forward
    B = x.shape[0]
    H, W = x.shape[-2], x.shape[-1]
    F = row_weight.shape[1]

    # PyTorch would raise an index error past the 50-entry table; Pallas would
    # silently read OOB VMEM, so guard here (shapes are static under jit).
    if H > row_weight.shape[0] or W > col_weight.shape[0]:
        raise ValueError(
            f"spatial size ({H}, {W}) exceeds embedding table size "
            f"({row_weight.shape[0]}, {col_weight.shape[0]})")

    # Tiny table prep outside the kernel (a few KB of traffic): slice to the
    # used rows and put the feature axis on sublanes so the kernel only does
    # lane broadcasts and full-width stores.
    col_t = jnp.transpose(col_weight[:W])  # (F, W)
    row_t = jnp.transpose(row_weight[:H])  # (F, H)

    pos_flat = pl.pallas_call(
        _pos_embed_kernel,
        out_shape=jax.ShapeDtypeStruct((2 * F, H * W), jnp.float32),
        grid_spec=pltpu.PrefetchScalarGridSpec(
            num_scalar_prefetch=0,
            grid=(1,),
            in_specs=[
                pl.BlockSpec((F, W), lambda i: (0, 0)),  # col table (transposed)
                pl.BlockSpec((F, H), lambda i: (0, 0)),  # row table (transposed)
            ],
            out_specs=pl.BlockSpec((2 * F, H * W), lambda i: (0, 0)),
        ),
        compiler_params=pltpu.CompilerParams(
            dimension_semantics=("arbitrary",)),
    )(col_t, row_t)

    # Free metadata reshape (row-major contiguous) + lazy batch broadcast:
    # no extra HBM round trip for a transpose or for B identical kernel writes.
    pos = pos_flat.reshape(2 * F, H, W)
    return jnp.broadcast_to(pos[None], (B, 2 * F, H, W))


if __name__ == "__main__":
    key = jax.random.PRNGKey(0)
    k_row, k_col, k_x = jax.random.split(key, 3)

    num_pos_feats = 16          # small, consistent with the module (default 256)
    B, C, H, W = 2, 4, 16, 16   # small spatial shapes

    # Deterministic parameter init: nn.init.uniform_ -> U[0, 1)
    row_weight = jax.random.uniform(k_row, (NUM_EMBED, num_pos_feats), jnp.float32)
    col_weight = jax.random.uniform(k_col, (NUM_EMBED, num_pos_feats), jnp.float32)

    x = jax.random.normal(k_x, (B, C, H, W), jnp.float32)
    mask = jnp.zeros((B, H, W), jnp.bool_)  # unused, signature parity

    pos = position_embedding_learned(x, mask, row_weight, col_weight)
    pos = jax.block_until_ready(pos)

    # Pure-JAX reference check (same semantics as the PyTorch forward).
    x_emb = col_weight[:W]                                  # (W, F)
    y_emb = row_weight[:H]                                  # (H, F)
    ref = jnp.concatenate(
        [jnp.broadcast_to(x_emb[None], (H, W, num_pos_feats)),
         jnp.broadcast_to(y_emb[:, None], (H, W, num_pos_feats))], axis=-1)
    ref = jnp.broadcast_to(jnp.transpose(ref, (2, 0, 1))[None],
                           (B, 2 * num_pos_feats, H, W))

    assert pos.shape == (B, 2 * num_pos_feats, H, W), pos.shape
    assert jnp.allclose(pos, ref), "mismatch vs reference"

    print("KERNEL_OK")
</pallas_src>

<mosaic_0001>
module attributes {stable_mosaic.version = 11 : i64} {
  func.func @_pos_embed_kernel(%arg0: i32, %arg1: memref<16x16xf32, #tpu.memory_space<vmem>>, %arg2: memref<16x16xf32, #tpu.memory_space<vmem>>, %arg3: memref<32x256xf32, #tpu.memory_space<vmem>>) attributes {dimension_semantics = [#tpu.dimension_semantics<arbitrary>], iteration_bounds = array<i64: 1>, scalar_prefetch = 0 : i64, scratch_operands = 0 : i64, tpu.core_type = #tpu.core_type<tc>, window_params = [{pipeline_mode = #tpu.pipeline_mode<synchronous>, transform_indices = @transform_0, window_bounds = array<i64: 16, 16>}, {pipeline_mode = #tpu.pipeline_mode<synchronous>, transform_indices = @transform_1, window_bounds = array<i64: 16, 16>}, {pipeline_mode = #tpu.pipeline_mode<synchronous>, transform_indices = @transform_2, window_bounds = array<i64: 32, 256>}]} {
    %c0 = arith.constant 0 : index
    %c0_0 = arith.constant 0 : index
    %0 = vector.load %arg1[%c0, %c0_0] : memref<16x16xf32, #tpu.memory_space<vmem>>, vector<16x16xf32>
    %c0_1 = arith.constant 0 : index
    %c0_2 = arith.constant 0 : index
    %1 = vector.load %arg2[%c0_1, %c0_2] : memref<16x16xf32, #tpu.memory_space<vmem>>, vector<16x16xf32>
    %2 = tpu.concatenate %0, %0, %0, %0, %0, %0, %0, %0, %0, %0, %0, %0, %0, %0, %0, %0 in 1 : vector<16x16xf32>, vector<16x16xf32>, vector<16x16xf32>, vector<16x16xf32>, vector<16x16xf32>, vector<16x16xf32>, vector<16x16xf32>, vector<16x16xf32>, vector<16x16xf32>, vector<16x16xf32>, vector<16x16xf32>, vector<16x16xf32>, vector<16x16xf32>, vector<16x16xf32>, vector<16x16xf32>, vector<16x16xf32> -> vector<16x256xf32>
    %3 = vector.extract_strided_slice %1 {offsets = [0, 0], sizes = [16, 1], strides = [1, 1]} : vector<16x16xf32> to vector<16x1xf32>
    %4 = vector.shape_cast %3 : vector<16x1xf32> to vector<16x1xf32>
    %5 = vector.broadcast %4 : vector<16x1xf32> to vector<16x16xf32>
    %6 = vector.extract_strided_slice %1 {offsets = [0, 1], sizes = [16, 1], strides = [1, 1]} : vector<16x16xf32> to vector<16x1xf32>
    %7 = vector.shape_cast %6 : vector<16x1xf32> to vector<16x1xf32>
    %8 = vector.broadcast %7 : vector<16x1xf32> to vector<16x16xf32>
    %9 = vector.extract_strided_slice %1 {offsets = [0, 2], sizes = [16, 1], strides = [1, 1]} : vector<16x16xf32> to vector<16x1xf32>
    %10 = vector.shape_cast %9 : vector<16x1xf32> to vector<16x1xf32>
    %11 = vector.broadcast %10 : vector<16x1xf32> to vector<16x16xf32>
    %12 = vector.extract_strided_slice %1 {offsets = [0, 3], sizes = [16, 1], strides = [1, 1]} : vector<16x16xf32> to vector<16x1xf32>
    %13 = vector.shape_cast %12 : vector<16x1xf32> to vector<16x1xf32>
    %14 = vector.broadcast %13 : vector<16x1xf32> to vector<16x16xf32>
    %15 = vector.extract_strided_slice %1 {offsets = [0, 4], sizes = [16, 1], strides = [1, 1]} : vector<16x16xf32> to vector<16x1xf32>
    %16 = vector.shape_cast %15 : vector<16x1xf32> to vector<16x1xf32>
    %17 = vector.broadcast %16 : vector<16x1xf32> to vector<16x16xf32>
    %18 = vector.extract_strided_slice %1 {offsets = [0, 5], sizes = [16, 1], strides = [1, 1]} : vector<16x16xf32> to vector<16x1xf32>
    %19 = vector.shape_cast %18 : vector<16x1xf32> to vector<16x1xf32>
    %20 = vector.broadcast %19 : vector<16x1xf32> to vector<16x16xf32>
    %21 = vector.extract_strided_slice %1 {offsets = [0, 6], sizes = [16, 1], strides = [1, 1]} : vector<16x16xf32> to vector<16x1xf32>
    %22 = vector.shape_cast %21 : vector<16x1xf32> to vector<16x1xf32>
    %23 = vector.broadcast %22 : vector<16x1xf32> to vector<16x16xf32>
    %24 = vector.extract_strided_slice %1 {offsets = [0, 7], sizes = [16, 1], strides = [1, 1]} : vector<16x16xf32> to vector<16x1xf32>
    %25 = vector.shape_cast %24 : vector<16x1xf32> to vector<16x1xf32>
    %26 = vector.broadcast %25 : vector<16x1xf32> to vector<16x16xf32>
    %27 = vector.extract_strided_slice %1 {offsets = [0, 8], sizes = [16, 1], strides = [1, 1]} : vector<16x16xf32> to vector<16x1xf32>
    %28 = vector.shape_cast %27 : vector<16x1xf32> to vector<16x1xf32>
    %29 = vector.broadcast %28 : vector<16x1xf32> to vector<16x16xf32>
    %30 = vector.extract_strided_slice %1 {offsets = [0, 9], sizes = [16, 1], strides = [1, 1]} : vector<16x16xf32> to vector<16x1xf32>
    %31 = vector.shape_cast %30 : vector<16x1xf32> to vector<16x1xf32>
    %32 = vector.broadcast %31 : vector<16x1xf32> to vector<16x16xf32>
    %33 = vector.extract_strided_slice %1 {offsets = [0, 10], sizes = [16, 1], strides = [1, 1]} : vector<16x16xf32> to vector<16x1xf32>
    %34 = vector.shape_cast %33 : vector<16x1xf32> to vector<16x1xf32>
    %35 = vector.broadcast %34 : vector<16x1xf32> to vector<16x16xf32>
    %36 = vector.extract_strided_slice %1 {offsets = [0, 11], sizes = [16, 1], strides = [1, 1]} : vector<16x16xf32> to vector<16x1xf32>
    %37 = vector.shape_cast %36 : vector<16x1xf32> to vector<16x1xf32>
    %38 = vector.broadcast %37 : vector<16x1xf32> to vector<16x16xf32>
    %39 = vector.extract_strided_slice %1 {offsets = [0, 12], sizes = [16, 1], strides = [1, 1]} : vector<16x16xf32> to vector<16x1xf32>
    %40 = vector.shape_cast %39 : vector<16x1xf32> to vector<16x1xf32>
    %41 = vector.broadcast %40 : vector<16x1xf32> to vector<16x16xf32>
    %42 = vector.extract_strided_slice %1 {offsets = [0, 13], sizes = [16, 1], strides = [1, 1]} : vector<16x16xf32> to vector<16x1xf32>
    %43 = vector.shape_cast %42 : vector<16x1xf32> to vector<16x1xf32>
    %44 = vector.broadcast %43 : vector<16x1xf32> to vector<16x16xf32>
    %45 = vector.extract_strided_slice %1 {offsets = [0, 14], sizes = [16, 1], strides = [1, 1]} : vector<16x16xf32> to vector<16x1xf32>
    %46 = vector.shape_cast %45 : vector<16x1xf32> to vector<16x1xf32>
    %47 = vector.broadcast %46 : vector<16x1xf32> to vector<16x16xf32>
    %48 = vector.extract_strided_slice %1 {offsets = [0, 15], sizes = [16, 1], strides = [1, 1]} : vector<16x16xf32> to vector<16x1xf32>
    %49 = vector.shape_cast %48 : vector<16x1xf32> to vector<16x1xf32>
    %50 = vector.broadcast %49 : vector<16x1xf32> to vector<16x16xf32>
    %51 = tpu.concatenate %5, %8, %11, %14, %17, %20, %23, %26, %29, %32, %35, %38, %41, %44, %47, %50 in 1 : vector<16x16xf32>, vector<16x16xf32>, vector<16x16xf32>, vector<16x16xf32>, vector<16x16xf32>, vector<16x16xf32>, vector<16x16xf32>, vector<16x16xf32>, vector<16x16xf32>, vector<16x16xf32>, vector<16x16xf32>, vector<16x16xf32>, vector<16x16xf32>, vector<16x16xf32>, vector<16x16xf32>, vector<16x16xf32> -> vector<16x256xf32>
    %c0_3 = arith.constant 0 : index
    %c0_4 = arith.constant 0 : index
    %52 = vector.load %arg3[%c0_3, %c0_4] : memref<32x256xf32, #tpu.memory_space<vmem>>, vector<16x256xf32>
    tpu.vector_store %arg3[%c0_3, %c0_4], %2 {strides = array<i32>} : memref<32x256xf32, #tpu.memory_space<vmem>>, vector<16x256xf32>,
    %c16 = arith.constant 16 : index
    %c0_5 = arith.constant 0 : index
    %53 = vector.load %arg3[%c16, %c0_5] : memref<32x256xf32, #tpu.memory_space<vmem>>, vector<16x256xf32>
    tpu.vector_store %arg3[%c16, %c0_5], %51 {strides = array<i32>} : memref<32x256xf32, #tpu.memory_space<vmem>>, vector<16x256xf32>,
    return
  }
  func.func @transform_0(%arg0: i32) -> (i32, i32) {
    %c0_i32 = arith.constant 0 : i32
    %c0_i32_0 = arith.constant 0 : i32
    %c0_i32_1 = arith.constant 0 : i32
    return %c0_i32, %c0_i32_0 : i32, i32
  }
  func.func @transform_1(%arg0: i32) -> (i32, i32) {
    %c0_i32 = arith.constant 0 : i32
    %c0_i32_0 = arith.constant 0 : i32
    %c0_i32_1 = arith.constant 0 : i32
    return %c0_i32, %c0_i32_0 : i32, i32
  }
  func.func @transform_2(%arg0: i32) -> (i32, i32) {
    %c0_i32 = arith.constant 0 : i32
    %c0_i32_0 = arith.constant 0 : i32
    %c0_i32_1 = arith.constant 0 : i32
    return %c0_i32, %c0_i32_0 : i32, i32
  }
}

</mosaic_0001>

<bundles_post_ra>
// kernel: position_embedding_learned.1
= control target key start
LH: loop header
LB: loop body
LE: loop exit
PB: predicated region body
PF: predicated region fallthrough
CT: control target
= control target key end

     0   :  { %v300_v1 = vmov 0   ;;  %s301_s11 = smov 32   ;;  %s302_s12 = smov 16   ;;  %v308_v5 = vmov 1   ;;  %v309_v6 = vmov 2   ;;  %v310_v7 = vmov 3   ;;  %s472_s0 = inlined_call_operand.vmem [shape: f32[16,16], index: 0, kind: input, shape index: {}]   ;;  %s473_s1 = inlined_call_operand.vmem [shape: f32[16,16], index: 1, kind: input, shape index: {}]   ;;  %s474_s2 = inlined_call_operand.vmem [shape: f32[32,256], index: 2, kind: output, shape index: {}]  }
   0x1   :  { %v341_v0 = vld [vmem:[%s472_s0] sm:$0xff]  ;;  %274 = vset.pattern.permute.xlu1 %v300_v1  ;;  %273 = vset.pattern.permute.xlu0 %v300_v1  ;;  %v348_v2 = vld [vmem:[%s472_s0 + $0x8] sm:$0xff]  ;;  %s303_s15 = smov 48   ;;  %s304_s16 = smov 64   ;;  %v311_v8 = vmov 4   ;;  %v312_v9 = vmov 6  }
   0x2   :  { %23 = vrot.lane.b32.xlu1 %v341_v0, %s301_s11  ;;  %17 = vrot.lane.b32.xlu0 %v341_v0, %s302_s12  ;;  %s305_s17 = smov 80   ;;  %s306_s0 = smov 96   ;;  %v365_v3 = vld [vmem:[%s473_s1 + $0x8] sm:$0xff]  ;;  %v370_v4 = vld [vmem:[%s473_s1] sm:$0xff]  ;;  %v313_v10 = vmov 8   ;;  %v314_v11 = vmov 5  }
   0x3   :  { %s307_s18 = smov 112   ;;  %v315_v12 = vmov 10   ;;  %v316_v13 = vmov 11   ;;  %v317_v14 = vmov 13   ;;  %v318_v15 = vmov 14  }
   0x4   :  { %v319_v16 = vmov 9   ;;  %v320_v17 = vmov 15   ;;  %v321_v18 = vmov 12   ;;  %v322_v19 = vmov 7  }
   0x5   :  { %vm59_vm0 = vcmask 130048   ;;  %vm62_vm1 = vcmask 261120   ;;  %vm65_vm2 = vcmask 392192   ;;  %vm68_vm3 = vcmask 523264  }
   0x6   :  { %25 = vrot.lane.b32.xlu1 %v348_v2, %s301_s11  ;;  %19 = vrot.lane.b32.xlu0 %v348_v2, %s302_s12  ;;  %vm71_vm4 = vcmask 654336   ;;  %vm74_vm5 = vcmask 785408   ;;  %vm77_vm6 = vcmask 916480  }
   0xa   :  { %31 = vrot.lane.b32.xlu1 %v348_v2, %s303_s15  ;;  %29 = vrot.lane.b32.xlu0 %v341_v0, %s303_s15 }
   0xe   :  { %37 = vrot.lane.b32.xlu1 %v348_v2, %s304_s16  ;;  %35 = vrot.lane.b32.xlu0 %v341_v0, %s304_s16 }
  0x12   :  { %43 = vrot.lane.b32.xlu1 %v348_v2, %s305_s17  ;;  %41 = vrot.lane.b32.xlu0 %v341_v0, %s305_s17 }
  0x16   :  { %49 = vrot.lane.b32.xlu1 %v348_v2, %s306_s0  ;;  %47 = vrot.lane.b32.xlu0 %v341_v0, %s306_s0 }
  0x1a   :  { %55 = vrot.lane.b32.xlu1 %v348_v2, %s307_s18  ;;  %53 = vrot.lane.b32.xlu0 %v341_v0, %s307_s18 }
  0x1e   :  { %87 = vperm.xlu1 %274, %v365_v3   ;;  %82 = vperm.xlu0 %273, %v370_v4  }
  0x22   :  { %275 = vset.pattern.permute.xlu1 %v308_v5  ;;  %276 = vset.pattern.permute.xlu0 %v308_v5 }
  0x23   :  { %91 = vperm.xlu1 %275, %v370_v4   ;;  %95 = vperm.xlu0 %276, %v365_v3  }
  0x27   :  { %277 = vset.pattern.permute.xlu1 %v309_v6  ;;  %278 = vset.pattern.permute.xlu0 %v310_v7 }
  0x28   :  { %99 = vperm.xlu1 %277, %v370_v4   ;;  %107 = vperm.xlu0 %278, %v370_v4  }
  0x2c   :  { %103 = vperm.xlu1 %277, %v365_v3   ;;  %281 = vset.pattern.permute.xlu0 %v311_v8 }
  0x2d   :  { %119 = vperm.xlu0 %281, %v365_v3  }
  0x30   :  { %279 = vset.pattern.permute.xlu1 %v310_v7 }
  0x31   :  { %111 = vperm.xlu1 %279, %v365_v3   ;;  %283 = vset.pattern.permute.xlu0 %v312_v9 }
  0x32   :  { %131 = vperm.xlu0 %283, %v370_v4  }
  0x35   :  { %280 = vset.pattern.permute.xlu1 %v311_v8 }
  0x36   :  { %115 = vperm.xlu1 %280, %v370_v4   ;;  %286 = vset.pattern.permute.xlu0 %v313_v10 }
  0x37   :  { %151 = vperm.xlu0 %286, %v365_v3  }
  0x3a   :  { %282 = vset.pattern.permute.xlu1 %v314_v11 }
  0x3b   :  { %123 = vperm.xlu1 %282, %v370_v4   ;;  %288 = vset.pattern.permute.xlu0 %v315_v12 }
  0x3c   :  { %163 = vperm.xlu0 %288, %v370_v4  }
  0x3f   :  { %127 = vperm.xlu1 %282, %v365_v3  }
  0x40   :  { %291 = vset.pattern.permute.xlu0 %v316_v13 }
  0x41   :  { %175 = vperm.xlu0 %291, %v365_v3  }
  0x43   :  { %284 = vset.pattern.permute.xlu1 %v312_v9 }
  0x44   :  { %135 = vperm.xlu1 %284, %v365_v3  }
  0x45   :  { %293 = vset.pattern.permute.xlu0 %v317_v14 }
  0x46   :  { %187 = vperm.xlu0 %293, %v370_v4  }
  0x48   :  { %285 = vset.pattern.permute.xlu1 %v313_v10 }
  0x49   :  { %147 = vperm.xlu1 %285, %v370_v4  }
  0x4a   :  { %296 = vset.pattern.permute.xlu0 %v318_v15 }
  0x4b   :  { %199 = vperm.xlu0 %296, %v365_v3  }
  0x4d   :  { %287 = vset.pattern.permute.xlu1 %v319_v16 }
  0x4e   :  { %155 = vperm.xlu1 %287, %v370_v4  }
  0x4f   :  { %298 = vset.pattern.permute.xlu0 %v320_v17 }
  0x50   :  { %203 = vperm.xlu0 %298, %v370_v4  }
  0x52   :  { %159 = vperm.xlu1 %287, %v365_v3  }
  0x56   :  { %289 = vset.pattern.permute.xlu1 %v315_v12 }
  0x57   :  { %167 = vperm.xlu1 %289, %v365_v3  }
  0x5b   :  { %290 = vset.pattern.permute.xlu1 %v316_v13 }
  0x5c   :  { %171 = vperm.xlu1 %290, %v370_v4  }
  0x60   :  { %292 = vset.pattern.permute.xlu1 %v321_v18 }
  0x61   :  { %179 = vperm.xlu1 %292, %v370_v4  }
  0x65   :  { %183 = vperm.xlu1 %292, %v365_v3  }
  0x69   :  { %294 = vset.pattern.permute.xlu1 %v317_v14 }
  0x6a   :  { %191 = vperm.xlu1 %294, %v365_v3  }
  0x6e   :  { %295 = vset.pattern.permute.xlu1 %v318_v15 }
  0x6f   :  { %195 = vperm.xlu1 %295, %v370_v4  }
  0x73   :  { %297 = vset.pattern.permute.xlu1 %v322_v19 }
  0x74   :  { %139 = vperm.xlu1 %297, %v370_v4   ;;  %v24_v20 = vpop.permute.xlu1 %23  ;;  %v18_v21 = vpop.permute.xlu0 %17 }
  0x75   :  { %v60_v30 = vsel %vm59_vm0, %v341_v0, %v18_v21 }
  0x76   :  { %v63_v33 = vsel %vm62_vm1, %v60_v30, %v24_v20 }
  0x78   :  { %143 = vperm.xlu1 %297, %v365_v3   ;;  %v26_v22 = vpop.permute.xlu1 %25  ;;  %v20_v23 = vpop.permute.xlu0 %19 }
  0x79   :  { %v61_v31 = vsel %vm59_vm0, %v348_v2, %v20_v23 }
  0x7a   :  { %v64_v32 = vsel %vm62_vm1, %v61_v31, %v26_v22 }
  0x7c   :  { %299 = vset.pattern.permute.xlu1 %v320_v17  ;;  %v32_v24 = vpop.permute.xlu1 %31  ;;  %v30_v25 = vpop.permute.xlu0 %29 }
  0x7d   :  { %207 = vperm.xlu1 %299, %v365_v3   ;;  %v67_v36 = vsel %vm65_vm2, %v64_v32, %v32_v24  ;;  %v66_v37 = vsel %vm65_vm2, %v63_v33, %v30_v25 }
  0x80   :  { %v38_v26 = vpop.permute.xlu1 %37  ;;  %v36_v27 = vpop.permute.xlu0 %35 }
  0x81   :  { %v70_v38 = vsel %vm68_vm3, %v67_v36, %v38_v26  ;;  %v69_v39 = vsel %vm68_vm3, %v66_v37, %v36_v27 }
  0x84   :  { %v44_v28 = vpop.permute.xlu1 %43  ;;  %v42_v29 = vpop.permute.xlu0 %41 }
  0x85   :  { %v73_v40 = vsel %vm71_vm4, %v70_v38, %v44_v28  ;;  %v72_v41 = vsel %vm71_vm4, %v69_v39, %v42_v29 }
  0x88   :  { %v50_v34 = vpop.permute.xlu1 %49  ;;  %v48_v35 = vpop.permute.xlu0 %47 }
  0x89   :  { %v76_v42 = vsel %vm74_vm5, %v73_v40, %v50_v34  ;;  %v75_v43 = vsel %vm74_vm5, %v72_v41, %v48_v35 }
  0x8c   :  { %v56_v44 = vpop.permute.xlu1 %55  ;;  %v54_v45 = vpop.permute.xlu0 %53 }
  0x8d   :  { %v79_v46 = vsel %vm77_vm6, %v76_v42, %v56_v44  ;;  %v78_v47 = vsel %vm77_vm6, %v75_v43, %v54_v45 }
  0x8e   :  { %240 = vst [vmem:[%s474_s2 + $0x10] sm:$0xff] %v79_v46  ;;  %241 = vst [vmem:[%s474_s2 + $0x18] sm:$0xff] %v79_v46 }
  0x8f   :  { %238 = vst [vmem:[%s474_s2] sm:$0xff] %v78_v47  ;;  %239 = vst [vmem:[%s474_s2 + $0x8] sm:$0xff] %v78_v47 }
  0x9d   :  { %v88_v48 = vpop.permute.xlu1 %87  ;;  %v83_v56 = vpop.permute.xlu0 %82 }
  0xa2   :  { %v92_v49 = vpop.permute.xlu1 %91  ;;  %v96_v58 = vpop.permute.xlu0 %95 }
  0xa3   :  { %v210_v13 = vsel %vm59_vm0, %v83_v56, %v92_v49  ;;  %v211_v23 = vsel %vm59_vm0, %v88_v48, %v96_v58 }
  0xa7   :  { %v100_v50 = vpop.permute.xlu1 %99  ;;  %v108_v60 = vpop.permute.xlu0 %107 }
  0xa8   :  { %v212_v15 = vsel %vm62_vm1, %v210_v13, %v100_v50 }
  0xa9   :  { %v214_v18 = vsel %vm65_vm2, %v212_v15, %v108_v60 }
  0xab   :  { %v104_v51 = vpop.permute.xlu1 %103 }
  0xac   :  { %v120_v61 = vpop.permute.xlu0 %119  ;;  %v213_v26 = vsel %vm62_vm1, %v211_v23, %v104_v51 }
  0xb0   :  { %v112_v52 = vpop.permute.xlu1 %111 }
  0xb1   :  { %v132_v63 = vpop.permute.xlu0 %131  ;;  %v215_v27 = vsel %vm65_vm2, %v213_v26, %v112_v52 }
  0xb2   :  { %v217_v33 = vsel %vm68_vm3, %v215_v27, %v120_v61 }
  0xb5   :  { %v116_v53 = vpop.permute.xlu1 %115 }
  0xb6   :  { %v152_v1 = vpop.permute.xlu0 %151  ;;  %v216_v21 = vsel %vm68_vm3, %v214_v18, %v116_v53 }
  0xba   :  { %v124_v54 = vpop.permute.xlu1 %123 }
  0xbb   :  { %v164_v3 = vpop.permute.xlu0 %163  ;;  %v218_v24 = vsel %vm71_vm4, %v216_v21, %v124_v54 }
  0xbc   :  { %v220_v28 = vsel %vm74_vm5, %v218_v24, %v132_v63 }
  0xbe   :  { %v128_v55 = vpop.permute.xlu1 %127 }
  0xbf   :  { %v219_v34 = vsel %vm71_vm4, %v217_v33, %v128_v55 }
  0xc0   :  { %v176_v5 = vpop.permute.xlu0 %175 }
  0xc3   :  { %v136_v57 = vpop.permute.xlu1 %135 }
  0xc4   :  { %v221_v35 = vsel %vm74_vm5, %v219_v34, %v136_v57 }
  0xc5   :  { %v188_v7 = vpop.permute.xlu0 %187 }
  0xc8   :  { %v148_v59 = vpop.permute.xlu1 %147 }
  0xca   :  { %v200_v10 = vpop.permute.xlu0 %199 }
  0xcd   :  { %v156_v62 = vpop.permute.xlu1 %155 }
  0xce   :  { %v224_v9 = vsel %vm59_vm0, %v148_v59, %v156_v62 }
  0xcf   :  { %v226_v11 = vsel %vm62_vm1, %v224_v9, %v164_v3  ;;  %v204_v17 = vpop.permute.xlu0 %203 }
  0xd1   :  { %v160_v0 = vpop.permute.xlu1 %159 }
  0xd2   :  { %v225_v29 = vsel %vm59_vm0, %v152_v1, %v160_v0 }
  0xd6   :  { %v168_v2 = vpop.permute.xlu1 %167 }
  0xd7   :  { %v227_v31 = vsel %vm62_vm1, %v225_v29, %v168_v2 }
  0xd8   :  { %v229_v36 = vsel %vm65_vm2, %v227_v31, %v176_v5 }
  0xdb   :  { %v172_v4 = vpop.permute.xlu1 %171 }
  0xdc   :  { %v228_v14 = vsel %vm65_vm2, %v226_v11, %v172_v4 }
  0xe0   :  { %v180_v6 = vpop.permute.xlu1 %179 }
  0xe1   :  { %v230_v16 = vsel %vm68_vm3, %v228_v14, %v180_v6 }
  0xe2   :  { %v232_v19 = vsel %vm71_vm4, %v230_v16, %v188_v7 }
  0xe4   :  { %v184_v8 = vpop.permute.xlu1 %183 }
  0xe5   :  { %v231_v38 = vsel %vm68_vm3, %v229_v36, %v184_v8 }
  0xe9   :  { %v192_v12 = vpop.permute.xlu1 %191 }
  0xea   :  { %v233_v40 = vsel %vm71_vm4, %v231_v38, %v192_v12 }
  0xeb   :  { %v235_v41 = vsel %vm74_vm5, %v233_v40, %v200_v10 }
  0xee   :  { %v196_v20 = vpop.permute.xlu1 %195 }
  0xef   :  { %v234_v22 = vsel %vm74_vm5, %v232_v19, %v196_v20 }
  0xf0   :  { %v236_v25 = vsel %vm77_vm6, %v234_v22, %v204_v17 }
  0xf1   :  { %243 = vst [vmem:[%s474_s2 + $0x28] sm:$0xff] %v236_v25 }
  0xf3   :  { %v140_v30 = vpop.permute.xlu1 %139 }
  0xf4   :  { %v222_v32 = vsel %vm77_vm6, %v220_v28, %v140_v30 }
  0xf5   :  { %242 = vst [vmem:[%s474_s2 + $0x20] sm:$0xff] %v222_v32 }
  0xf7   :  { %v144_v37 = vpop.permute.xlu1 %143 }
  0xf8   :  { %v223_v39 = vsel %vm77_vm6, %v221_v35, %v144_v37 }
  0xf9   :  { %244 = vst [vmem:[%s474_s2 + $0x30] sm:$0xff] %v223_v39 }
  0xfc   :  { %v208_v42 = vpop.permute.xlu1 %207 }
  0xfd   :  { %v237_v43 = vsel %vm77_vm6, %v235_v41, %v208_v42 }
  0xfe   :  { %245 = vst [vmem:[%s474_s2 + $0x38] sm:$0xff] %v237_v43 }

</bundles_post_ra>
